<compile_context>
chip_gen: v6e
topology: v6e:2x2x1
jax: 0.10.0
libtpu: 0.0.40
codegen_flags: <defaults>
</compile_context>

<pallas_src>
import jax
import jax.numpy as jnp
from jax.experimental import pallas as pl
from jax.experimental.pallas import tpu as pltpu

LANE = 128     # lane width  (last-dim tiling unit)
SUBLANE = 8    # sublane width


def _round_up(n, m):
    return (n + m - 1) // m * m


def _cdiv(a, b):
    return (a + b - 1) // b


# ----------------------------------------------------------------------------- kernel

def residual_block_kernel(x_ref, wcat_ref, bcat_ref, w2_ref, b2_ref, o_ref):
    """Computes one (TM, Fp) output tile.

    x_ref    : (TM, Fin)    f32   activation tile (pipelined over the batch grid)
    wcat_ref : (Fin, 2*Fp)  bf16  fused [w1 | w_skip]   (resident, single-buffered)
    bcat_ref : (1, 2*Fp)    f32   fused [b1 | b_skip]   (resident, single-buffered)
    w2_ref   : (Fp, Fp)     bf16  linear2 weight        (resident, single-buffered)
    b2_ref   : (1, Fp)      f32   linear2 bias          (resident, single-buffered)
    o_ref    : (TM, Fp)     out_dtype output tile
    """
    fp = o_ref.shape[-1]
    x = x_ref[...].astype(wcat_ref.dtype)   # in-kernel f32 -> bf16 cast (VPU)

    # Fused Fin contraction: one MXU pass produces [linear1(x) | skip_connection(x)].
    hcat = jnp.dot(x, wcat_ref[...], preferred_element_type=jnp.float32) + bcat_ref[...]
    h = jnp.maximum(hcat[:, :fp], 0.0)       # relu(linear1(x))      -- f32
    identity = hcat[:, fp:]                  # skip_connection(x)    -- f32

    # dropout(p) is the identity in eval/inference mode.

    out = jnp.dot(h.astype(w2_ref.dtype), w2_ref[...],
                  preferred_element_type=jnp.float32) + b2_ref[...]
    out = out + identity
    o_ref[...] = jnp.maximum(out, 0.0).astype(o_ref.dtype)


# ------------------------------------------------------------------- one-time weight prep

def prepare_params(w1, b1, w2, b2, ws=None, bs=None):
    """One-time parameter preparation (hoisted out of the per-call path).

    w1, ws : (Fin, Fout)   pre-transposed vs PyTorch's (out, in)
    w2     : (Fout, Fout)  pre-transposed
    b*     : (Fout,) or (1, Fout)
    ws=None emulates the nn.Identity skip (in_features == out_features) via I / 0.
    """
    Fin, Fout = w1.shape
    if ws is None:
        ws = jnp.eye(Fin, Fout, dtype=w1.dtype)
        bs = jnp.zeros((Fout,), dtype=w1.dtype)

    Fp = _round_up(Fout, LANE)               # lane-dense hidden / output width

    def pad2(a, rows, cols):
        return jnp.pad(a, ((0, rows - a.shape[0]), (0, cols - a.shape[1])))

    b1 = jnp.reshape(b1, (1, -1))
    b2 = jnp.reshape(b2, (1, -1))
    bs = jnp.reshape(bs, (1, -1))

    # Fuse the two Fin-contractions into one (Fin, 2*Fp) bf16 weight. Zero pad columns
    # are numerically inert (0 weight + 0 bias -> 0 -> relu 0 -> 0 contribution).
    wcat = jnp.concatenate([pad2(w1, Fin, Fp), pad2(ws, Fin, Fp)], axis=1).astype(jnp.bfloat16)
    bcat = jnp.concatenate([pad2(b1, 1, Fp), pad2(bs, 1, Fp)], axis=1).astype(jnp.float32)
    w2p = pad2(w2, Fp, Fp).astype(jnp.bfloat16)
    b2p = pad2(b2, 1, Fp).astype(jnp.float32)

    return dict(wcat=wcat, bcat=bcat, w2=w2p, b2=b2p, fin=Fin, fout=Fout, fp=Fp)


# ------------------------------------------------------------------------ per-call wrapper

def residual_block(x, params, *, tm=512, out_dtype=jnp.bfloat16):
    """ResidualBlock forward (eval mode). x: (B, Fin) float32."""
    B, Fin = x.shape
    assert Fin == params["fin"], "x feature dim does not match prepared params"
    Fout, Fp = params["fout"], params["fp"]
    wcat, bcat, w2, b2 = params["wcat"], params["bcat"], params["w2"], params["b2"]

    # Big batch tiles amortize the ~0.35us/step overhead, but keep >= 2 grid steps so
    # v7x's two TensorCores both receive work on the "parallel" axis.
    tm = min(tm, _round_up(_cdiv(B, 2), SUBLANE))
    tm = max(SUBLANE, _round_up(tm, SUBLANE))
    grid = (_cdiv(B, tm),)    # ragged last tile is safe: rows are independent, OOB dropped

    resident = pl.Buffered(buffer_count=1)   # constant index_map -> no double buffering

    flops = 2 * B * (Fin * 2 * Fp + Fp * Fp)
    bytes_accessed = (x.size * x.dtype.itemsize
                      + wcat.size * 2 + bcat.size * 4 + w2.size * 2 + b2.size * 4
                      + B * Fp * jnp.dtype(out_dtype).itemsize)

    out_p = pl.pallas_call(
        residual_block_kernel,
        out_shape=jax.ShapeDtypeStruct((B, Fp), out_dtype),
        grid_spec=pltpu.PrefetchScalarGridSpec(
            num_scalar_prefetch=0,
            grid=grid,
            in_specs=[
                # Activations pipeline over the batch grid (double-buffered by default).
                pl.BlockSpec((tm, Fin), lambda i: (i, 0)),
                # Weights / biases: constant index_map + single buffer -> fetched once,
                # stay resident at half the VMEM of default double buffering.
                pl.BlockSpec((Fin, 2 * Fp), lambda i: (0, 0), pipeline_mode=resident),
                pl.BlockSpec((1, 2 * Fp), lambda i: (0, 0), pipeline_mode=resident),
                pl.BlockSpec((Fp, Fp), lambda i: (0, 0), pipeline_mode=resident),
                pl.BlockSpec((1, Fp), lambda i: (0, 0), pipeline_mode=resident),
            ],
            # If xprof shows exposed writeback DMA on v6e at the chosen tm, add
            # pipeline_mode=pl.Buffered(3) here (and on the x in_spec).
            out_specs=pl.BlockSpec((tm, Fp), lambda i: (i, 0)),
        ),
        compiler_params=pltpu.CompilerParams(
            dimension_semantics=("parallel",),        # shards batch tiles on v7x's 2 TCs
            vmem_limit_bytes=48 * 1024 * 1024,        # above 32 MiB default, < 64 MiB v7x
        ),
        cost_estimate=pl.CostEstimate(
            flops=flops, transcendentals=0, bytes_accessed=bytes_accessed),
    )(x, wcat, bcat, w2, b2)

    return out_p[:, :Fout]


# ----------------------------------------------------------------------------- reference

def reference(x, w1, b1, w2, b2, ws, bs):
    b1 = jnp.reshape(b1, (1, -1)); b2 = jnp.reshape(b2, (1, -1)); bs = jnp.reshape(bs, (1, -1))
    identity = x @ ws + bs
    h = jnp.maximum(x @ w1 + b1, 0.0)
    out = h @ w2 + b2 + identity
    return jnp.maximum(out, 0.0)


if __name__ == "__main__":
    key = jax.random.PRNGKey(0)
    # in_features != out_features -> skip_connection is a Linear.
    # B and Fout deliberately not tile-aligned: exercises ragged batch tiles + Fout padding.
    B, Fin, Fout = 200, 16, 64

    ks = jax.random.split(key, 7)
    x  = jax.random.normal(ks[0], (B, Fin), dtype=jnp.float32)
    # Parameters stored as (in, out), i.e. transposed relative to PyTorch's (out, in).
    w1 = jax.random.normal(ks[1], (Fin, Fout), dtype=jnp.float32) * 0.1
    b1 = jax.random.normal(ks[2], (1, Fout), dtype=jnp.float32) * 0.1
    w2 = jax.random.normal(ks[3], (Fout, Fout), dtype=jnp.float32) * 0.1
    b2 = jax.random.normal(ks[4], (1, Fout), dtype=jnp.float32) * 0.1
    ws = jax.random.normal(ks[5], (Fin, Fout), dtype=jnp.float32) * 0.1
    bs = jax.random.normal(ks[6], (1, Fout), dtype=jnp.float32) * 0.1

    # Weight prep happens once (amortized across forward calls).
    params = jax.tree.map(jax.block_until_ready, prepare_params(w1, b1, w2, b2, ws, bs))

    out = jax.block_until_ready(residual_block(x, params))
    ref = reference(x, w1, b1, w2, b2, ws, bs)

    assert out.shape == (B, Fout)
    # bf16 MXU operands + bf16 output vs f32 reference -> loose tolerance.
    assert jnp.allclose(out.astype(jnp.float32), ref, atol=5e-2, rtol=5e-2), \
        "mismatch vs f32 reference"
    print("KERNEL_OK")
</pallas_src>

<mosaic_0001>
module attributes {stable_mosaic.version = 11 : i64} {
  func.func @residual_block_kernel(%arg0: i32, %arg1: memref<104x16xf32, #tpu.memory_space<vmem>>, %arg2: memref<16x256xbf16, #tpu.memory_space<vmem>>, %arg3: memref<1x256xf32, #tpu.memory_space<vmem>>, %arg4: memref<128x128xbf16, #tpu.memory_space<vmem>>, %arg5: memref<1x128xf32, #tpu.memory_space<vmem>>, %arg6: memref<104x128xbf16, #tpu.memory_space<vmem>>) attributes {dimension_semantics = [#tpu.dimension_semantics<parallel>], iteration_bounds = array<i64: 2>, scalar_prefetch = 0 : i64, scratch_operands = 0 : i64, tpu.core_type = #tpu.core_type<tc>, window_params = [{transform_indices = @transform_0, window_bounds = array<i64: 104, 16>}, {pipeline_mode = #tpu.pipeline_mode<synchronous>, transform_indices = @transform_1, window_bounds = array<i64: 16, 256>}, {pipeline_mode = #tpu.pipeline_mode<synchronous>, transform_indices = @transform_2, window_bounds = array<i64: 1, 256>}, {pipeline_mode = #tpu.pipeline_mode<synchronous>, transform_indices = @transform_3, window_bounds = array<i64: 128, 128>}, {pipeline_mode = #tpu.pipeline_mode<synchronous>, transform_indices = @transform_4, window_bounds = array<i64: 1, 128>}, {transform_indices = @transform_5, window_bounds = array<i64: 104, 128>}]} {
    %c0 = arith.constant 0 : index
    %c0_0 = arith.constant 0 : index
    %0 = vector.load %arg1[%c0, %c0_0] : memref<104x16xf32, #tpu.memory_space<vmem>>, vector<104x16xf32>
    %1 = arith.truncf %0 : vector<104x16xf32> to vector<104x16xbf16>
    %c0_1 = arith.constant 0 : index
    %c0_2 = arith.constant 0 : index
    %2 = vector.load %arg2[%c0_1, %c0_2] : memref<16x256xbf16, #tpu.memory_space<vmem>>, vector<16x256xbf16>
    %cst = arith.constant dense<0.000000e+00> : vector<104x256xf32>
    %3 = tpu.matmul %1, %2, %cst {dimension_numbers = #tpu.dot_dimension_numbers<[1], [0], [0], [1], [0, 0, 1, 1], [], []>} : vector<104x16xbf16>, vector<16x256xbf16>, vector<104x256xf32> -> vector<104x256xf32>
    %c0_3 = arith.constant 0 : index
    %c0_4 = arith.constant 0 : index
    %4 = vector.load %arg3[%c0_3, %c0_4] : memref<1x256xf32, #tpu.memory_space<vmem>>, vector<1x256xf32>
    %5 = vector.broadcast %4 : vector<1x256xf32> to vector<104x256xf32>
    %6 = arith.addf %3, %5 : vector<104x256xf32>
    %7 = vector.extract_strided_slice %6 {offsets = [0, 0], sizes = [104, 128], strides = [1, 1]} : vector<104x256xf32> to vector<104x128xf32>
    %cst_5 = arith.constant 0.000000e+00 : f32
    %8 = vector.broadcast %cst_5 : f32 to vector<104x128xf32>
    %9 = arith.maximumf %7, %8 : vector<104x128xf32>
    %10 = vector.extract_strided_slice %6 {offsets = [0, 128], sizes = [104, 128], strides = [1, 1]} : vector<104x256xf32> to vector<104x128xf32>
    %11 = arith.truncf %9 : vector<104x128xf32> to vector<104x128xbf16>
    %c0_6 = arith.constant 0 : index
    %c0_7 = arith.constant 0 : index
    %12 = vector.load %arg4[%c0_6, %c0_7] : memref<128x128xbf16, #tpu.memory_space<vmem>>, vector<128x128xbf16>
    %cst_8 = arith.constant dense<0.000000e+00> : vector<104x128xf32>
    %13 = tpu.matmul %11, %12, %cst_8 {dimension_numbers = #tpu.dot_dimension_numbers<[1], [0], [0], [1], [0, 0, 1, 1], [], []>} : vector<104x128xbf16>, vector<128x128xbf16>, vector<104x128xf32> -> vector<104x128xf32>
    %c0_9 = arith.constant 0 : index
    %c0_10 = arith.constant 0 : index
    %14 = vector.load %arg5[%c0_9, %c0_10] : memref<1x128xf32, #tpu.memory_space<vmem>>, vector<1x128xf32>
    %15 = vector.broadcast %14 : vector<1x128xf32> to vector<104x128xf32>
    %16 = arith.addf %13, %15 : vector<104x128xf32>
    %17 = arith.addf %16, %10 : vector<104x128xf32>
    %cst_11 = arith.constant 0.000000e+00 : f32
    %18 = vector.broadcast %cst_11 : f32 to vector<104x128xf32>
    %19 = arith.maximumf %17, %18 : vector<104x128xf32>
    %20 = arith.truncf %19 : vector<104x128xf32> to vector<104x128xbf16>
    %c0_12 = arith.constant 0 : index
    %c0_13 = arith.constant 0 : index
    %21 = vector.load %arg6[%c0_12, %c0_13] : memref<104x128xbf16, #tpu.memory_space<vmem>>, vector<104x128xbf16>
    tpu.vector_store %arg6[%c0_12, %c0_13], %20 {strides = array<i32>} : memref<104x128xbf16, #tpu.memory_space<vmem>>, vector<104x128xbf16>,
    return
  }
  func.func @transform_0(%arg0: i32) -> (i32, i32) {
    %c0_i32 = arith.constant 0 : i32
    %c0_i32_0 = arith.constant 0 : i32
    return %arg0, %c0_i32 : i32, i32
  }
  func.func @transform_1(%arg0: i32) -> (i32, i32) {
    %c0_i32 = arith.constant 0 : i32
    %c0_i32_0 = arith.constant 0 : i32
    %c0_i32_1 = arith.constant 0 : i32
    return %c0_i32, %c0_i32_0 : i32, i32
  }
  func.func @transform_2(%arg0: i32) -> (i32, i32) {
    %c0_i32 = arith.constant 0 : i32
    %c0_i32_0 = arith.constant 0 : i32
    %c0_i32_1 = arith.constant 0 : i32
    return %c0_i32, %c0_i32_0 : i32, i32
  }
  func.func @transform_3(%arg0: i32) -> (i32, i32) {
    %c0_i32 = arith.constant 0 : i32
    %c0_i32_0 = arith.constant 0 : i32
    %c0_i32_1 = arith.constant 0 : i32
    return %c0_i32, %c0_i32_0 : i32, i32
  }
  func.func @transform_4(%arg0: i32) -> (i32, i32) {
    %c0_i32 = arith.constant 0 : i32
    %c0_i32_0 = arith.constant 0 : i32
    %c0_i32_1 = arith.constant 0 : i32
    return %c0_i32, %c0_i32_0 : i32, i32
  }
  func.func @transform_5(%arg0: i32) -> (i32, i32) {
    %c0_i32 = arith.constant 0 : i32
    %c0_i32_0 = arith.constant 0 : i32
    return %arg0, %c0_i32 : i32, i32
  }
}

</mosaic_0001>

<bundles_post_ra>
// kernel: tpu_custom_call.1
= control target key start
LH: loop header
LB: loop body
LE: loop exit
PB: predicated region body
PF: predicated region fallthrough
CT: control target
= control target key end

     0   :  { %10 = vsyncpa [#allocation3], 0  ;;  %s1408_s0 = inlined_call_operand.vmem [shape: f32[200,16], index: 0, kind: input, shape index: {}]   ;;  %s1409_s1 = inlined_call_operand.vmem [shape: bf16[16,256], index: 1, kind: input, shape index: {}]   ;;  %s1410_s2 = inlined_call_operand.vmem [shape: f32[1,256], index: 2, kind: input, shape index: {}]   ;;  %s1411_s3 = inlined_call_operand.vmem [shape: bf16[128,128], index: 3, kind: input, shape index: {}]   ;;  %s1412_s4 = inlined_call_operand.vmem [shape: f32[1,128], index: 4, kind: input, shape index: {}]   ;;  %s1413_s5 = inlined_call_operand.hbm [shape: bf16[200,128], index: 5, kind: output, shape index: {}]  }
   0x1   :  { %12 = vsyncpa [#allocation3 + $0x1], 0  ;;  %s1091_s18 = smov 0   ;;  %s1093_s19 = smov 0  }
   0x2   :  { %s1095_s20 = smov 0   ;;  %s1097_s21 = smov 0  }
   0x3 LB: > { %s1112_s22 = sadd.s32 4294967295, %s1053_s21   ;;  %s771_s23 = sadd.s32 4294967294, %s1053_s21   ;;  %s1053_s21 = sphi %s1097_s21, %s1419_s21   ;;  %s1049_s20 = sphi %s1095_s20, %s1418_s20   ;;  %s1045_s19 = sphi %s1093_s19, %s1417_s19   ;;  %s1041_s18 = sphi %s1091_s18, %s1416_s18  }
   0x4   : > { %s1116_s24 = sadd.s32 1, %s1053_s21   ;;  %s135_s25 = sadd.s32 1, %s1049_s20 }
   0x5   : > { %s132_s26 = ssub.s32 %s1053_s21, %s1116_s24  ;;  %p145_p0 = scmp.ne.s32.totalorder %s1049_s20, %s1045_s19 }
   0x6   : > { %p133_p1 = scmp.eq.s32.totalorder %s132_s26, 0  ;;  %p146_p2 = scmp.eq.s32.totalorder %s1112_s22, 1 }
   0x7   : > { %p151_p3 = scmp.ne.s32.totalorder %s1045_s19, %s1041_s18  ;;  %p152_p4 = scmp.eq.s32.totalorder %s771_s23, 1 }
   0x8   : > { %s1127_s27 = scalar_select %p133_p1, %s1049_s20, %s135_s25  }
   0x9   : > { %p1129_p5 = por %p146_p2, %p145_p0  ;;  %p1133_p6 = por %p152_p4, %p151_p3 }
   0xa   : > { %p774_p7 = scmp.ge.s32.totalorder %s1053_s21, 1  ;;  %p199_p8 = scmp.lt.s32.totalorder %s1053_s21, 3 }
   0xc   : > { %p200_p9 = pnand %p774_p7, %p199_p8 }
   0xd   : > { %s1143_s7 = smul.u32 (!%p200_p9), 13, %s1112_s22 }
   0xe   : > { %203 = sbr.rel (%p200_p9) target bundleno = 507 (0x1fb), region = 40 }
   0xf   : > { %p236_p10 = scmp.lt.s32.totalorder (!%p200_p9), %s1143_s7, 24 }
  0x13   : > { %v982_v0 = vld [vmem:[%s1409_s1 + $0x4] ss:$8 sps:$4 sm:$0xff]   ;;  %v984_v1 = vld [vmem:[%s1409_s1] ss:$8 sps:$4 sm:$0xff]   ;;  %v1055_v2 = vmov 0   ;;  %v985_v3 = vld [vmem:[%s1411_s3 + $0x38] sm:$0xff]   ;;  %v275_v32 = vlaneseq }
  0x14   : > { %349 = vmatprep.mubr.bf16.mxu0 %v1055_v2  ;;  %331 = vmatprep.subr.bf16.mxu0 %v982_v0  ;;  %v1056_v4 = vmov 0.0   ;;  %s237_s12 = scalar_select %p236_p10, %s1143_s7, 24  ;;  %v986_v5 = vld [vmem:[%s1411_s3 + $0x30] sm:$0xff]   ;;  %vm295_vm0 = vcmask 130048   ;;  %v987_v10 = vld [vmem:[%s1411_s3 + $0x28] sm:$0xff]   ;;  %v988_v13 = vld [vmem:[%s1411_s3 + $0x20] sm:$0xff]  }
  0x15   : > { %922 = vmatprep.subr.bf16.mxu1 %v1056_v4  ;;  %332 = vmatpush1.bf16.msra.mxu0 %v984_v1  ;;  %v989_v14 = vld [vmem:[%s1411_s3 + $0x18] sm:$0xff]   ;;  %v990_v29 = vld [vmem:[%s1411_s3 + $0x10] sm:$0xff]   ;;  %v991_v30 = vld [vmem:[%s1411_s3 + $0x8] sm:$0xff]   ;;  %vm1057_vm1 = vmmov 0   ;;  %v1226_v33 = vshrl.u32 %v275_v32, 7  ;;  %s698_s9 = ssub.s32 (%p1129_p5), 25, %s1143_s7 }
  0x16   : > { %878 = vmatprep.subr.bf16.mxu0 %v1056_v4  ;;  %930 = vmatpush3.bf16.msra.mxu1 %v985_v3  ;;  %s775_s13 = sshll.u32 %s237_s12, 3  ;;  %v992_v31 = vld [vmem:[%s1411_s3] sm:$0xff]   ;;  %p699_p11 = scmp.lt.s32.totalorder (%p1129_p5), %s698_s9, 13 }
  0x17   : > { %923 = vmatprep.subr.bf16.mxu1 %v1056_v4  ;;  %s1163_s23 = scalar_lea.vmem %s1408_s0, %s775_s13  ;;  %898 = vmatprep.mubr.msk.bf16.mxu1 %vm1057_vm1, %v1056_v4  ;;  %v277_v34 = vsub.s32 0, %v1226_v33  ;;  %v1232_v35 = vld [vmem:[%s1410_s2] sm:$0x3] }
  0x18   : > { %v251_v6 = vld [vmem:[%s1163_s23] sm:$0xff]  ;;  %v252_v7 = vld [vmem:[%s1163_s23 + $0x8] sm:$0xff]  ;;  %v253_v9 = vld [vmem:[%s1163_s23 + $0x10] sm:$0xff] }
  0x19   : > { %v264_v8 = vpack.c.bf16 %v252_v7, %v251_v6  ;;  %v254_v11 = vld [vmem:[%s1163_s23 + $0x18] sm:$0xff]  ;;  %v255_v15 = vld [vmem:[%s1163_s23 + $0x20] sm:$0xff]  ;;  %v256_v16 = vld [vmem:[%s1163_s23 + $0x28] sm:$0xff]  ;;  %v1235_v36 = vrot.slane %v1232_v35, %v277_v34 }
  0x1a   : > { %931 = vmatpush3.bf16.msra.mxu1 %v986_v5  ;;  %v265_v12 = vpack.c.bf16 %v254_v11, %v253_v9  ;;  %v266_v17 = vpack.c.bf16 %v256_v16, %v255_v15  ;;  %v257_v18 = vld [vmem:[%s1163_s23 + $0x30] sm:$0xff]  ;;  %v258_v19 = vld [vmem:[%s1163_s23 + $0x38] sm:$0xff]  ;;  %v259_v21 = vld [vmem:[%s1163_s23 + $0x40] sm:$0xff] }
  0x1b   : > { %924 = vmatprep.subr.bf16.mxu1 %v1056_v4  ;;  %778 = vmatmul.mubr.msk.bf16.vlgmr.msra.gmra.mxu0 %vm295_vm0, %v264_v8  ;;  %v267_v20 = vpack.c.bf16 %v258_v19, %v257_v18  ;;  %v260_v22 = vld [vmem:[%s1163_s23 + $0x48] sm:$0xff]  ;;  %v261_v24 = vld [vmem:[%s1163_s23 + $0x50] sm:$0xff]  ;;  %v262_v25 = vld [vmem:[%s1163_s23 + $0x58] sm:$0xff] }
  0x1c   : > { %359 = vmatprep.mubr.bf16.mxu0 %v1055_v2  ;;  %879 = vmatpush3.bf16.msra.mxu0 %v985_v3  ;;  %v268_v23 = vpack.c.bf16 %v260_v22, %v259_v21  ;;  %v269_v26 = vpack.c.bf16 %v262_v25, %v261_v24  ;;  %v263_v27 = vld [vmem:[%s1163_s23 + $0x60] sm:$0xff]  ;;  %s228_s23 = sand.u32 1, %s1045_s19  }
  0x1d   : > { %880 = vmatprep.subr.bf16.mxu0 %v1056_v4  ;;  %v270_v28 = vpack.c.bf16 %v263_v27, %v263_v27  ;;  %s938_s30 = smul.u32 52, %s228_s23  ;;  %s1348_s8 = scalar_lea.sflag [#allocation3], %s228_s23 }
  0x1e   : > { %932 = vmatpush3.bf16.msra.mxu1 %v987_v10 }
  0x1f   : > { %925 = vmatprep.subr.bf16.mxu1 %v1056_v4  ;;  %s1309_s6 = scalar_lea.vmem [#allocation2], %s938_s30 }
  0x20   : > { %881 = vmatpush3.bf16.msra.mxu0 %v986_v5 }
  0x21   : > { %882 = vmatprep.subr.bf16.mxu0 %v1056_v4 }
  0x22   : > { %933 = vmatpush3.bf16.msra.mxu1 %v988_v13 }
  0x23   : > { %926 = vmatprep.subr.bf16.mxu1 %v1056_v4  ;;  %779 = vmatmul.mubr.msk.bf16.gmra.mxu0 %vm295_vm0, %v265_v12 }
  0x24   : > { %369 = vmatprep.mubr.bf16.mxu0 %v1055_v2  ;;  %883 = vmatpush3.bf16.msra.mxu0 %v987_v10 }
  0x25   : > { %884 = vmatprep.subr.bf16.mxu0 %v1056_v4 }
  0x26   : > { %934 = vmatpush3.bf16.msra.mxu1 %v989_v14 }
  0x27   : > { %927 = vmatprep.subr.bf16.mxu1 %v1056_v4 }
  0x28   : > { %885 = vmatpush3.bf16.msra.mxu0 %v988_v13 }
  0x29   : > { %886 = vmatprep.subr.bf16.mxu0 %v1056_v4 }
  0x2a   : > { %935 = vmatpush3.bf16.msra.mxu1 %v990_v29 }
  0x2b   : > { %780 = vmatmul.mubr.msk.bf16.gmra.mxu0 %vm295_vm0, %v266_v17  ;;  %928 = vmatprep.subr.bf16.mxu1 %v1056_v4 }
  0x2c   : > { %379 = vmatprep.mubr.bf16.mxu0 %v1055_v2  ;;  %887 = vmatpush3.bf16.msra.mxu0 %v989_v14 }
  0x2d   : > { %888 = vmatprep.subr.bf16.mxu0 %v1056_v4 }
  0x2e   : > { %936 = vmatpush3.bf16.msra.mxu1 %v991_v30 }
  0x2f   : > { %929 = vmatprep.subr.bf16.mxu1 %v1056_v4 }
  0x30   : > { %889 = vmatpush3.bf16.msra.mxu0 %v990_v29 }
  0x31   : > { %890 = vmatprep.subr.bf16.mxu0 %v1056_v4 }
  0x32   : > { %937 = vmatpush3.bf16.msra.mxu1 %v992_v31 }
  0x33   : > { %781 = vmatmul.mubr.msk.bf16.gmra.mxu0 %vm295_vm0, %v267_v20 }
  0x34   : > { %389 = vmatprep.mubr.bf16.mxu0 %v1055_v2  ;;  %891 = vmatpush3.bf16.msra.mxu0 %v991_v30 }
  0x35   : > { %892 = vmatprep.subr.bf16.mxu0 %v1056_v4 }
  0x38   : > { %893 = vmatpush3.bf16.msra.mxu0 %v992_v31 }
  0x3b   : > { %782 = vmatmul.mubr.msk.bf16.gmra.mxu0 %vm295_vm0, %v268_v23 }
  0x3c   : > { %399 = vmatprep.mubr.bf16.mxu0 %v1055_v2 }
  0x43   : > { %783 = vmatmul.mubr.msk.bf16.gmra.mxu0 %vm295_vm0, %v269_v26 }
  0x44   : > { %409 = vmatprep.mubr.bf16.mxu0 %v1055_v2 }
  0x4b   : > { %784 = vmatmul.mubr.msk.bf16.gmra.mxu0 %vm295_vm0, %v270_v28 }
  0x4c   : > { %894 = vmatprep.mubr.msk.bf16.mxu0 %vm1057_vm1, %v1056_v4 }
  0xdb   : > { %v351_v37 = vpop.f32.mrf.mxu0 }
  0xdc   : > { %v352_v39 = vadd.f32 %v351_v37, %v1235_v36 }
  0xdd   : > { %v1237_v38 = vpop.f32.mrf.mxu0 }
  0xde   : > { %v418_v43 = vmax.f32 %v352_v39, 0.0  ;;  %v281_v39 = vsub.s32 1, %v1226_v33 }
  0xdf   : > { %v355_v40 = vpop.f32.mrf.mxu0 }
  0xe0   : > { %v356_v41 = vadd.f32 %v355_v40, %v1235_v36  ;;  %v1291_v40 = vld [vmem:[%s1412_s4] ss:$0 sm:$0xff] }
  0xe1   : > { %v1241_v42 = vpop.f32.mrf.mxu0 }
  0xe2   : > { %v419_v44 = vmax.f32 %v356_v41, 0.0 }
  0xe3   : > { %v361_v45 = vpop.f32.mrf.mxu0 }
  0xe4   : > { %v431_v46 = vpack.c.bf16 %v419_v44, %v418_v43  ;;  %v362_v48 = vadd.f32 %v361_v45, %v1235_v36 }
  0xe5   : > { %v1243_v47 = vpop.f32.mrf.mxu0 }
  0xe6   : > { %895 = vmatmul.mubr.bf16.vlgmr.msra.gmra.mxu0 %v431_v46  ;;  %v420_v52 = vmax.f32 %v362_v48, 0.0 }
  0xe7   : > { %v365_v49 = vpop.f32.mrf.mxu0 }
  0xe8   : > { %v366_v50 = vadd.f32 %v365_v49, %v1235_v36 }
  0xe9   : > { %v1247_v51 = vpop.f32.mrf.mxu0 }
  0xea   : > { %v421_v53 = vmax.f32 %v366_v50, 0.0 }
  0xeb   : > { %v371_v54 = vpop.f32.mrf.mxu0 }
  0xec   : > { %v432_v55 = vpack.c.bf16 %v421_v53, %v420_v52  ;;  %v372_v57 = vadd.f32 %v371_v54, %v1235_v36 }
  0xed   : > { %v1249_v56 = vpop.f32.mrf.mxu0 }
  0xee   : > { %899 = vmatmul.mubr.bf16.vlgmr.msra.gmra.mxu1 %v432_v55  ;;  %v422_v61 = vmax.f32 %v372_v57, 0.0 }
  0xef   : > { %v375_v58 = vpop.f32.mrf.mxu0  ;;  %902 = vmatprep.mubr.msk.bf16.mxu1 %vm1057_vm1, %v1056_v4 }
  0xf0   : > { %v376_v59 = vadd.f32 %v375_v58, %v1235_v36 }
  0xf1   : > { %v1255_v60 = vpop.f32.mrf.mxu0 }
  0xf2   : > { %v423_v62 = vmax.f32 %v376_v59, 0.0 }
  0xf3   : > { %v381_v63 = vpop.f32.mrf.mxu0 }
  0xf4   : > { %v433_v0 = vpack.c.bf16 %v423_v62, %v422_v61  ;;  %v382_v2 = vadd.f32 %v381_v63, %v1235_v36 }
  0xf5   : > { %v1257_v1 = vpop.f32.mrf.mxu0 }
  0xf6   : > { %903 = vmatmul.mubr.bf16.gmra.mxu1 %v433_v0  ;;  %v424_v7 = vmax.f32 %v382_v2, 0.0 }
  0xf7   : > { %v385_v3 = vpop.f32.mrf.mxu0  ;;  %906 = vmatprep.mubr.msk.bf16.mxu1 %vm1057_vm1, %v1056_v4 }
  0xf8   : > { %v386_v5 = vadd.f32 %v385_v3, %v1235_v36 }
  0xf9   : > { %v1263_v6 = vpop.f32.mrf.mxu0 }
  0xfa   : > { %v425_v8 = vmax.f32 %v386_v5, 0.0 }
  0xfb   : > { %v391_v9 = vpop.f32.mrf.mxu0 }
  0xfc   : > { %v434_v10 = vpack.c.bf16 %v425_v8, %v424_v7  ;;  %v392_v12 = vadd.f32 %v391_v9, %v1235_v36 }
  0xfd   : > { %v1265_v11 = vpop.f32.mrf.mxu0 }
  0xfe   : > { %907 = vmatmul.mubr.bf16.gmra.mxu1 %v434_v10  ;;  %v426_v16 = vmax.f32 %v392_v12, 0.0 }
  0xff   : > { %v395_v13 = vpop.f32.mrf.mxu0  ;;  %910 = vmatprep.mubr.msk.bf16.mxu1 %vm1057_vm1, %v1056_v4 }
 0x100   : > { %v396_v14 = vadd.f32 %v395_v13, %v1235_v36 }
 0x101   : > { %v1271_v15 = vpop.f32.mrf.mxu0 }
 0x102   : > { %v427_v17 = vmax.f32 %v396_v14, 0.0 }
 0x103   : > { %v401_v18 = vpop.f32.mrf.mxu0 }
 0x104   : > { %v435_v19 = vpack.c.bf16 %v427_v17, %v426_v16  ;;  %v402_v21 = vadd.f32 %v401_v18, %v1235_v36 }
 0x105   : > { %v1273_v20 = vpop.f32.mrf.mxu0 }
 0x106   : > { %911 = vmatmul.mubr.bf16.gmra.mxu1 %v435_v19  ;;  %v428_v25 = vmax.f32 %v402_v21, 0.0 }
 0x107   : > { %v405_v22 = vpop.f32.mrf.mxu0  ;;  %914 = vmatprep.mubr.msk.bf16.mxu1 %vm1057_vm1, %v1056_v4 }
 0x108   : > { %v406_v23 = vadd.f32 %v405_v22, %v1235_v36 }
 0x109   : > { %v1279_v24 = vpop.f32.mrf.mxu0 }
 0x10a   : > { %v429_v26 = vmax.f32 %v406_v23, 0.0 }
 0x10b   : > { %v411_v27 = vpop.f32.mrf.mxu0 }
 0x10c   : > { %v436_v28 = vpack.c.bf16 %v429_v26, %v428_v25  ;;  %v412_v29 = vadd.f32 %v411_v27, %v1235_v36  ;;  %v1294_v36 = vrot.slane %v1232_v35, %v281_v39 }
 0x10d   : > { %v1282_v30 = vpop.f32.mrf.mxu0 }
 0x10e   : > { %v430_v31 = vmax.f32 %v412_v29, 0.0  ;;  %915 = vmatmul.mubr.bf16.gmra.mxu1 %v436_v28  ;;  %v358_v46 = vadd.f32 %v1241_v42, %v1294_v36  ;;  %v368_v42 = vadd.f32 %v1247_v51, %v1294_v36  ;;  %v374_v7 = vadd.f32 %v1249_v56, %v1294_v36 }
 0x10f   : > { %v415_v32 = vpop.f32.mrf.mxu0  ;;  %918 = vmatprep.mubr.msk.bf16.mxu1 %vm1057_vm1, %v1056_v4  ;;  %v354_v4 = vadd.f32 %v1237_v38, %v1294_v36  ;;  %v364_v38 = vadd.f32 %v1243_v47, %v1294_v36  ;;  %v378_v9 = vadd.f32 %v1255_v60, %v1294_v36  ;;  %v384_v56 = vadd.f32 %v1257_v1, %v1294_v36 }
 0x110   : > { %v437_v37 = vpack.c.bf16 %v430_v31, %v430_v31  ;;  %v388_v60 = vadd.f32 %v1263_v6, %v1294_v36  ;;  %v394_v1 = vadd.f32 %v1265_v11, %v1294_v36  ;;  %v398_v6 = vadd.f32 %v1271_v15, %v1294_v36 }
 0x111   : > { %v416_v34 = vpop.f32.mrf.mxu0  ;;  %v404_v11 = vadd.f32 %v1273_v20, %v1294_v36  ;;  %v408_v15 = vadd.f32 %v1279_v24, %v1294_v36 }
 0x116   : > { %919 = vmatmul.mubr.bf16.gmra.mxu1 %v437_v37 }
 0x1a6   : > { %v543_v41 = vpop.f32.mrf.mxu0 }
 0x1a7   : > { %v544_v43 = vadd.f32 %v1291_v40, %v543_v41 }
 0x1a8   : > { %v896_v44 = vpop.f32.mrf.mxu0 }
 0x1a9   : > { %v597_v33 = vadd.f32 %v544_v43, %v354_v4 }
 0x1aa   : > { %v546_v45 = vpop.f32.mrf.mxu0 }
 0x1ab   : > { %v547_v48 = vadd.f32 %v1291_v40, %v546_v45  ;;  %v610_v52 = vmax.f32 %v597_v33, 0.0 }
 0x1ac   : > { %v897_v49 = vpop.f32.mrf.mxu0 }
 0x1ad   : > { %v598_v50 = vadd.f32 %v547_v48, %v358_v46 }
 0x1ae   : > { %v551_v35 = vpop.f32.mrf.mxu1 }
 0x1af   : > { %v611_v53 = vmax.f32 %v598_v50, 0.0  ;;  %v552_v54 = vadd.f32 %v1291_v40, %v551_v35 }
 0x1b0   : > { %v900_v55 = vpop.f32.mrf.mxu1 }
 0x1b1   : > { %v831_v57 = vpack.c.bf16 %v611_v53, %v610_v52  ;;  %v599_v59 = vadd.f32 %v552_v54, %v364_v38 }
 0x1b2   : > { %v554_v58 = vpop.f32.mrf.mxu1 }
 0x1b3   : > { %832 = vst [vmem:[%s1309_s6] sm:$0xff] %v831_v57   ;;  %v555_v61 = vadd.f32 %v1291_v40, %v554_v58  ;;  %v612_v2 = vmax.f32 %v599_v59, 0.0  ;;  %v414_v58 = vadd.f32 %v1282_v30, %v1294_v36 }
 0x1b4   : > { %v901_v62 = vpop.f32.mrf.mxu1 }
 0x1b5   : > { %v600_v63 = vadd.f32 %v555_v61, %v368_v42 }
 0x1b6   : > { %v559_v0 = vpop.f32.mrf.mxu1 }
 0x1b7   : > { %v613_v3 = vmax.f32 %v600_v63, 0.0  ;;  %v560_v47 = vadd.f32 %v1291_v40, %v559_v0 }
 0x1b8   : > { %v904_v5 = vpop.f32.mrf.mxu1 }
 0x1b9   : > { %v836_v51 = vpack.c.bf16 %v613_v3, %v612_v2  ;;  %v601_v10 = vadd.f32 %v560_v47, %v374_v7 }
 0x1ba   : > { %v562_v8 = vpop.f32.mrf.mxu1 }
 0x1bb   : > { %858 = vst [vmem:[%s1309_s6 + $0x8] sm:$0xff] %v836_v51   ;;  %v563_v12 = vadd.f32 %v1291_v40, %v562_v8  ;;  %v614_v17 = vmax.f32 %v601_v10, 0.0 }
 0x1bc   : > { %v905_v13 = vpop.f32.mrf.mxu1 }
 0x1bd   : > { %v602_v14 = vadd.f32 %v563_v12, %v378_v9 }
 0x1be   : > { %v567_v16 = vpop.f32.mrf.mxu1 }
 0x1bf   : > { %v615_v18 = vmax.f32 %v602_v14, 0.0  ;;  %v568_v19 = vadd.f32 %v1291_v40, %v567_v16 }
 0x1c0   : > { %v908_v21 = vpop.f32.mrf.mxu1 }
 0x1c1   : > { %v841_v22 = vpack.c.bf16 %v615_v18, %v614_v17  ;;  %v603_v25 = vadd.f32 %v568_v19, %v384_v56 }
 0x1c2   : > { %v570_v23 = vpop.f32.mrf.mxu1 }
 0x1c3   : > { %859 = vst [vmem:[%s1309_s6 + $0x10] sm:$0xff] %v841_v22   ;;  %v571_v26 = vadd.f32 %v1291_v40, %v570_v23  ;;  %v616_v31 = vmax.f32 %v603_v25, 0.0 }
 0x1c4   : > { %v909_v27 = vpop.f32.mrf.mxu1 }
 0x1c5   : > { %v604_v28 = vadd.f32 %v571_v26, %v388_v60 }
 0x1c6   : > { %v575_v29 = vpop.f32.mrf.mxu1 }
 0x1c7   : > { %v617_v32 = vmax.f32 %v604_v28, 0.0  ;;  %v576_v34 = vadd.f32 %v1291_v40, %v575_v29 }
 0x1c8   : > { %v912_v37 = vpop.f32.mrf.mxu1 }
 0x1c9   : > { %v846_v39 = vpack.c.bf16 %v617_v32, %v616_v31  ;;  %v605_v43 = vadd.f32 %v576_v34, %v394_v1 }
 0x1ca   : > { %v578_v41 = vpop.f32.mrf.mxu1 }
 0x1cb   : > { %860 = vst [vmem:[%s1309_s6 + $0x18] sm:$0xff] %v846_v39   ;;  %v579_v44 = vadd.f32 %v1291_v40, %v578_v41  ;;  %v618_v33 = vmax.f32 %v605_v43, 0.0 }
 0x1cc   : > { %v913_v4 = vpop.f32.mrf.mxu1 }
 0x1cd   : > { %v606_v45 = vadd.f32 %v579_v44, %v398_v6 }
 0x1ce   : > { %v583_v46 = vpop.f32.mrf.mxu1 }
 0x1cf   : > { %v619_v48 = vmax.f32 %v606_v45, 0.0  ;;  %v584_v49 = vadd.f32 %v1291_v40, %v583_v46 }
 0x1d0   : > { %v916_v50 = vpop.f32.mrf.mxu1 }
 0x1d1   : > { %v851_v35 = vpack.c.bf16 %v619_v48, %v618_v33  ;;  %v607_v53 = vadd.f32 %v584_v49, %v404_v11 }
 0x1d2   : > { %v586_v52 = vpop.f32.mrf.mxu1 }
 0x1d3   : > { %861 = vst [vmem:[%s1309_s6 + $0x20] sm:$0xff] %v851_v35   ;;  %v587_v54 = vadd.f32 %v1291_v40, %v586_v52  ;;  %v620_v42 = vmax.f32 %v607_v53, 0.0 }
 0x1d4   : > { %v917_v55 = vpop.f32.mrf.mxu1 }
 0x1d5   : > { %v608_v38 = vadd.f32 %v587_v54, %v408_v15 }
 0x1d6   : > { %v591_v57 = vpop.f32.mrf.mxu1 }
 0x1d7   : > { %v621_v20 = vmax.f32 %v608_v38, 0.0  ;;  %v592_v59 = vadd.f32 %v1291_v40, %v591_v57 }
 0x1d8   : > { %v920_v61 = vpop.f32.mrf.mxu1 }
 0x1d9   : > { %v856_v62 = vpack.c.bf16 %v621_v20, %v620_v42  ;;  %v609_v63 = vadd.f32 %v592_v59, %v414_v58 }
 0x1da   : > { %v594_v24 = vpop.f32.mrf.mxu1 }
 0x1db   : > { %862 = vst [vmem:[%s1309_s6 + $0x28] sm:$0xff] %v856_v62   ;;  %v622_v0 = vmax.f32 %v609_v63, 0.0  ;;  %696 = sbr.rel (!%p1129_p5) target bundleno = 507 (0x1fb), region = 44 }
 0x1dc   : > { %v921_v2 = vpop.f32.mrf.mxu1 }
 0x1dd   : > { %v826_v3 = vpack.c.bf16 %v622_v0, %v622_v0 }
 0x1df   : > { %688 = vst [vmem:[%s1309_s6 + $0x30] sm:$0xf] %v826_v3 }
 0x1e0   : > { %s1421_s9 = smov (!%p699_p11, %s698_s9), 13 }
 0x1e1   : > { %s1353_s10 = sshll.u32 %s1421_s9, 6 }
 0x1e2   : > { %s703_s11 = ssub.s32 832, %s1353_s10 }
 0x1e3   : > { %704 = vsyncadd %s1348_s8, %s703_s11  ;;  %p808_p12 = scmp.ne.s32.totalorder %s1353_s10, 0  ;;  %s827_s12 = smul.u32 832, %s1112_s22 }
 0x1e4   : > { %s709_s13 = sshll.u32 %s1309_s6, 4  ;;  %s1058_s16 = smov [#allocation2]   ;;  %s1365_s13 = int_to_ptr.vmem [resolvable:$true] %s709_s13 }
 0x1e5   : > { %s1363_s15 = scalar_lea.hbm %s1413_s5, %s827_s12  ;;  %s993_s7 = scalar_lea.vmem %s1365_s13, %s1353_s10 }
 0x1e6   : > { %p994_p13 = scmp.ne.s32.totalorder %s1365_s13, %s993_s7  ;;  %s997_s17 = sshll.u32 %s1058_s16, 4  ;;  %s998_s17 = int_to_ptr.vmem [resolvable:$false] %s997_s17 }
 0x1e7   : > { %s999_s22 = scalar_lea.vmem %s998_s17, 1664  ;;  %p1000_p2 = scmp.lt.s32.totalorder %s1365_s13, %s998_s17 }
 0x1e8   : > { %p995_p0 = pnand %p994_p13, %p808_p12  ;;  %p1001_p3 = scmp.lt.s32.totalorder %s999_s22, %s993_s7 }
 0x1ea   : > { %p996_p1 = pneg %p995_p0  ;;  %p1002_p4 = por %p1001_p3, %p1000_p2 }
 0x1ec   : > { %p1003_p5 = pnand %p1002_p4, %p996_p1 }
 0x1ee   : > { %1006 = shalt.err (!%p1003_p5)
}
 0x1ef   : > { %s1007_s23 = scalar_lea.hbm %s1363_s15, %s1353_s10  ;;  %s1011_s30 = scalar_lea.hbm %s1413_s5, 1600 }
 0x1f0   : > { %p1008_p7 = scmp.ne.s32.totalorder %s1363_s15, %s1007_s23  ;;  %p1012_p10 = scmp.lt.s32.totalorder %s1363_s15, %s1413_s5 }
 0x1f1   : > { %p1013_p11 = scmp.lt.s32.totalorder %s1011_s30, %s1007_s23 }
 0x1f2   : > { %p1009_p8 = pnand %p1008_p7, %p808_p12 }
 0x1f3   : > { %p1014_p13 = por %p1013_p11, %p1012_p10 }
 0x1f4   : > { %p1010_p9 = pneg %p1009_p8 }
 0x1f6   : > { %p1015_p0 = pnand %p1014_p13, %p1010_p9 }
 0x1f8   : > { %1018 = shalt.err (!%p1015_p0)
}
 0x1f9   : > { %s1059_s11 = smov 64   ;;  %s1060_s12 = smov 4  }
 0x1fa   : > { %715 = dma.vmem_to_hbm [thread:$0]  (%p808_p12), %s1365_s13, %s1353_s10, %s1363_s15, %s1348_s8, %s1059_s11, %s1059_s11, %s1060_s12  }
 0x1fb PF: > { %p944_p1 = scmp.ge.s32.totalorder %s1053_s21, 2  ;;  %s724_s28 = sand.u32 1, %s1041_s18  }
 0x1fc   : > { %s725_s14 = scalar_lea.sflag [#allocation3], %s724_s28 }
 0x1fd   : > { %p941_p2 = pnand %p944_p1, %p1133_p6 }
 0x1ff   : > { %p942_p3 = pneg %p941_p2 }
 0x201   : > { %1036 = dma.done.wait (%p942_p3), %s725_s14, 832  }
 0x202   : > { %1038 = vsyncadd (%p942_p3), %s725_s14, 4294966464  ;;  %p15_p4 = scmp.ge.s32.totalorder %s1116_s24, 4   ;;  %s1416_s18 = smov %s1045_s19 }
 0x203   : > { %s1417_s19 = smov %s1049_s20  ;;  %s1418_s20 = smov %s1127_s27 }
 0x204   : > { %s1419_s21 = smov %s1116_s24  ;;  %17 = sbr.rel (!%p15_p4) target bundleno = 3 (0x3), region = 75 }
 0x209   :  { %730 = vsyncpa [#allocation3], 1 }
 0x20a   :  { %732 = vsyncpa [#allocation3 + $0x1], 1 }

</bundles_post_ra>
